<compile_context>
chip_gen: v6e
topology: v6e:2x2x1
jax: 0.10.0
libtpu: 0.0.40
codegen_flags: <defaults>
</compile_context>

<pallas_src>
import jax
import jax.numpy as jnp
from jax.experimental import pallas as pl
from jax.experimental.pallas import tpu as pltpu

IN_FEATURES = 1 * 28 * 28   # 784
HIDDEN = 28                 # logical hidden width (PyTorch module)
OUT = 10                    # logical number of classes
HIDDEN_PAD = 128            # lane-dense padded hidden width
OUT_PAD = 128               # lane-dense padded class width
TB_DEFAULT = 1024           # batch tile (double-buffered f32 x tile ~6 MiB: fits v5e/v6e/v7x)
NEG_BIG = -1e30             # finite "-inf" (safe through the bf16 output cast)


def _round_up(x, m):
    return ((x + m - 1) // m) * m


def mnist_mlp_kernel(x_ref, w1_ref, b1_ref, w2_ref, b2_ref, o_ref):
    # x_ref:  (TB, 784)   f32  (cast to bf16 in VMEM: no extra HBM round trip)
    # w1_ref: (784, 128)  bf16 (cols >= 28 are zero)
    # b1_ref: (1, 128)    f32  (cols >= 28 are zero)
    # w2_ref: (128, 128)  bf16 (rows >= 28 and cols >= 10 are zero)
    # b2_ref: (1, 128)    f32  (cols >= 10 are -1e30 -> padded lanes vanish in softmax)
    # o_ref:  (TB, 128)   bf16 (only cols < 10 are meaningful)
    x = x_ref[...].astype(jnp.bfloat16)

    # fc1 + ReLU  (bf16 operands, f32 accumulation on the MXU)
    h = jnp.dot(x, w1_ref[...], preferred_element_type=jnp.float32) + b1_ref[...]
    h = jnp.maximum(h, 0.0)

    # fc2: padded hidden lanes are exactly 0 -> contribute nothing; padded class
    # lanes end up equal to b2 = -1e30, so no explicit mask is needed below.
    logits = jnp.dot(h.astype(jnp.bfloat16), w2_ref[...],
                     preferred_element_type=jnp.float32) + b2_ref[...]

    # Numerically stable log_softmax along the lane axis. The row max is always a
    # real logit (-1e30 never wins) and exp(-1e30 - m) == 0 in f32, so the
    # normalization only sees the 10 real classes.
    m = jnp.max(logits, axis=-1, keepdims=True)
    shifted = logits - m
    lse = jnp.log(jnp.sum(jnp.exp(shifted), axis=-1, keepdims=True))
    o_ref[...] = (shifted - lse).astype(o_ref.dtype)


def _pad_params(w1, b1, w2, b2):
    """Zero-pad HIDDEN->128, OUT->128; bake the class mask into b2; bf16 weights."""
    w1p = jnp.zeros((IN_FEATURES, HIDDEN_PAD), jnp.float32).at[:, :HIDDEN].set(w1)
    b1p = jnp.zeros((1, HIDDEN_PAD), jnp.float32).at[:, :HIDDEN].set(b1)
    w2p = jnp.zeros((HIDDEN_PAD, OUT_PAD), jnp.float32).at[:HIDDEN, :OUT].set(w2)
    b2p = jnp.full((1, OUT_PAD), NEG_BIG, jnp.float32).at[:, :OUT].set(b2)
    return w1p.astype(jnp.bfloat16), b1p, w2p.astype(jnp.bfloat16), b2p


def _pick_tile(B, tb):
    """Batch tile: multiple of 16 rows, >=2 grid steps when the batch allows it."""
    tb = min(tb, B)
    if B >= 32:
        # Cap so the grid has at least 2 steps (v7x megacore) and round to 16-row
        # sublane granularity (bf16-friendly layout; partial last tile is fine
        # because every op is row-independent and OOB writes are discarded).
        tb = min(tb, _round_up(pl.cdiv(B, 2), 16))
        tb = _round_up(tb, 16)
    return tb


def mnist_forward(x_nchw, w1, b1, w2, b2, *, tb=TB_DEFAULT):
    """x_nchw: (B, 1, 28, 28) float32 -> (B, 10) log-probabilities (float32)."""
    B = x_nchw.shape[0]
    # Same flatten as torch's input.view([B, 784]); kept f32 — the bf16 cast happens
    # inside the kernel, so x is read from HBM exactly once at 4 B/elem.
    x = x_nchw.reshape(B, IN_FEATURES)

    w1p, b1p, w2p, b2p = _pad_params(w1, b1, w2, b2)

    tb = _pick_tile(B, tb)
    grid = (pl.cdiv(B, tb),)

    cost = pl.CostEstimate(
        flops=2 * B * (IN_FEATURES * HIDDEN_PAD + HIDDEN_PAD * OUT_PAD),
        transcendentals=B * (OUT_PAD + 1),
        bytes_accessed=(x.size * 4 + w1p.size * 2 + w2p.size * 2
                        + b1p.size * 4 + b2p.size * 4 + B * OUT_PAD * 2),
    )

    out_padded = pl.pallas_call(
        mnist_mlp_kernel,
        out_shape=jax.ShapeDtypeStruct((B, OUT_PAD), jnp.bfloat16),
        grid_spec=pltpu.PrefetchScalarGridSpec(
            num_scalar_prefetch=0,
            grid=grid,
            in_specs=[
                pl.BlockSpec((tb, IN_FEATURES), lambda i: (i, 0)),           # x: streamed
                pl.BlockSpec((IN_FEATURES, HIDDEN_PAD), lambda i: (0, 0)),   # w1: resident
                pl.BlockSpec((1, HIDDEN_PAD), lambda i: (0, 0)),             # b1: resident
                pl.BlockSpec((HIDDEN_PAD, OUT_PAD), lambda i: (0, 0)),       # w2: resident
                pl.BlockSpec((1, OUT_PAD), lambda i: (0, 0)),                # b2: resident
            ],
            out_specs=pl.BlockSpec((tb, OUT_PAD), lambda i: (i, 0)),
        ),
        compiler_params=pltpu.CompilerParams(
            dimension_semantics=("parallel",),   # batch tiles shard across TCs on v7x
        ),
        cost_estimate=cost,
    )(x, w1p, b1p, w2p, b2p)

    # Drop padded class lanes; upcast once (small fused op: reads bf16, writes (B,10) f32).
    return out_padded[:, :OUT].astype(jnp.float32)


def mnist_reference(x_nchw, w1, b1, w2, b2):
    """Pure-JAX f32 reference matching the PyTorch module."""
    x = x_nchw.reshape(x_nchw.shape[0], IN_FEATURES)
    h = jnp.maximum(x @ w1 + b1, 0.0)
    logits = h @ w2 + b2
    return jax.nn.log_softmax(logits, axis=-1)


def init_params(key):
    """Deterministic init mimicking nn.Linear's uniform(-1/sqrt(fan_in), 1/sqrt(fan_in))."""
    k1, k2, k3, k4 = jax.random.split(key, 4)
    bound1 = 1.0 / jnp.sqrt(IN_FEATURES)
    bound2 = 1.0 / jnp.sqrt(HIDDEN)
    # stored as (in, out) so the kernel computes x @ W + b (== torch's x @ W.T + b)
    w1 = jax.random.uniform(k1, (IN_FEATURES, HIDDEN), jnp.float32, -bound1, bound1)
    b1 = jax.random.uniform(k2, (1, HIDDEN), jnp.float32, -bound1, bound1)
    w2 = jax.random.uniform(k3, (HIDDEN, OUT), jnp.float32, -bound2, bound2)
    b2 = jax.random.uniform(k4, (1, OUT), jnp.float32, -bound2, bound2)
    return w1, b1, w2, b2


if __name__ == "__main__":
    key = jax.random.PRNGKey(0)
    kx, kp = jax.random.split(key)

    B = 8
    x = jax.random.normal(kx, (B, 1, 28, 28), jnp.float32)  # NCHW like PyTorch MNIST
    w1, b1, w2, b2 = init_params(kp)

    fwd = jax.jit(mnist_forward)
    out = jax.block_until_ready(fwd(x, w1, b1, w2, b2))

    assert out.shape == (B, 10)
    assert bool(jnp.all(jnp.isfinite(out)))

    # bf16 operands / bf16 output store -> compare against f32 reference with a loose
    # tolerance, and check log_softmax normalization (prob rows sum to ~1).
    ref = mnist_reference(x, w1, b1, w2, b2)
    assert jnp.allclose(out, ref, atol=6e-2), float(jnp.max(jnp.abs(out - ref)))
    probs_sum = jnp.sum(jnp.exp(out), axis=-1)
    assert jnp.allclose(probs_sum, 1.0, atol=5e-2)

    print("KERNEL_OK")
</pallas_src>

<mosaic_0001>
module attributes {stable_mosaic.version = 11 : i64} {
  func.func @mnist_mlp_kernel(%arg0: i32, %arg1: memref<8x784xf32, #tpu.memory_space<vmem>>, %arg2: memref<784x128xbf16, #tpu.memory_space<vmem>>, %arg3: memref<1x128xf32, #tpu.memory_space<vmem>>, %arg4: memref<128x128xbf16, #tpu.memory_space<vmem>>, %arg5: memref<1x128xf32, #tpu.memory_space<vmem>>, %arg6: memref<8x128xbf16, #tpu.memory_space<vmem>>) attributes {dimension_semantics = [#tpu.dimension_semantics<parallel>], iteration_bounds = array<i64: 1>, scalar_prefetch = 0 : i64, scratch_operands = 0 : i64, tpu.core_type = #tpu.core_type<tc>, window_params = [{transform_indices = @transform_0, window_bounds = array<i64: 8, 784>}, {pipeline_mode = #tpu.pipeline_mode<synchronous>, transform_indices = @transform_1, window_bounds = array<i64: 784, 128>}, {pipeline_mode = #tpu.pipeline_mode<synchronous>, transform_indices = @transform_2, window_bounds = array<i64: 1, 128>}, {pipeline_mode = #tpu.pipeline_mode<synchronous>, transform_indices = @transform_3, window_bounds = array<i64: 128, 128>}, {pipeline_mode = #tpu.pipeline_mode<synchronous>, transform_indices = @transform_4, window_bounds = array<i64: 1, 128>}, {transform_indices = @transform_5, window_bounds = array<i64: 8, 128>}]} {
    %c0 = arith.constant 0 : index
    %c0_0 = arith.constant 0 : index
    %0 = vector.load %arg1[%c0, %c0_0] : memref<8x784xf32, #tpu.memory_space<vmem>>, vector<8x784xf32>
    %1 = arith.truncf %0 : vector<8x784xf32> to vector<8x784xbf16>
    %c0_1 = arith.constant 0 : index
    %c0_2 = arith.constant 0 : index
    %2 = vector.load %arg2[%c0_1, %c0_2] : memref<784x128xbf16, #tpu.memory_space<vmem>>, vector<784x128xbf16>
    %cst = arith.constant dense<0.000000e+00> : vector<8x128xf32>
    %3 = tpu.matmul %1, %2, %cst {dimension_numbers = #tpu.dot_dimension_numbers<[1], [0], [0], [1], [0, 0, 1, 1], [], []>} : vector<8x784xbf16>, vector<784x128xbf16>, vector<8x128xf32> -> vector<8x128xf32>
    %c0_3 = arith.constant 0 : index
    %c0_4 = arith.constant 0 : index
    %4 = vector.load %arg3[%c0_3, %c0_4] : memref<1x128xf32, #tpu.memory_space<vmem>>, vector<1x128xf32>
    %5 = vector.broadcast %4 : vector<1x128xf32> to vector<8x128xf32>
    %6 = arith.addf %3, %5 : vector<8x128xf32>
    %cst_5 = arith.constant 0.000000e+00 : f32
    %7 = vector.broadcast %cst_5 : f32 to vector<8x128xf32>
    %8 = arith.maximumf %6, %7 : vector<8x128xf32>
    %9 = arith.truncf %8 : vector<8x128xf32> to vector<8x128xbf16>
    %c0_6 = arith.constant 0 : index
    %c0_7 = arith.constant 0 : index
    %10 = vector.load %arg4[%c0_6, %c0_7] : memref<128x128xbf16, #tpu.memory_space<vmem>>, vector<128x128xbf16>
    %cst_8 = arith.constant dense<0.000000e+00> : vector<8x128xf32>
    %11 = tpu.matmul %9, %10, %cst_8 {dimension_numbers = #tpu.dot_dimension_numbers<[1], [0], [0], [1], [0, 0, 1, 1], [], []>} : vector<8x128xbf16>, vector<128x128xbf16>, vector<8x128xf32> -> vector<8x128xf32>
    %c0_9 = arith.constant 0 : index
    %c0_10 = arith.constant 0 : index
    %12 = vector.load %arg5[%c0_9, %c0_10] : memref<1x128xf32, #tpu.memory_space<vmem>>, vector<1x128xf32>
    %13 = vector.broadcast %12 : vector<1x128xf32> to vector<8x128xf32>
    %14 = arith.addf %11, %13 : vector<8x128xf32>
    %cst_11 = arith.constant dense<0xFF800000> : vector<8xf32>
    %15 = vector.multi_reduction <maximumf>, %14, %cst_11 [1] : vector<8x128xf32> to vector<8xf32>
    %16 = vector.shape_cast %15 : vector<8xf32> to vector<8x1xf32>
    %17 = vector.broadcast %16 : vector<8x1xf32> to vector<8x128xf32>
    %18 = arith.subf %14, %17 : vector<8x128xf32>
    %19 = math.exp %18 : vector<8x128xf32>
    %cst_12 = arith.constant dense<0.000000e+00> : vector<8xf32>
    %20 = vector.multi_reduction <add>, %19, %cst_12 [1] : vector<8x128xf32> to vector<8xf32>
    %21 = vector.shape_cast %20 : vector<8xf32> to vector<8x1xf32>
    %22 = math.log %21 : vector<8x1xf32>
    %23 = vector.broadcast %22 : vector<8x1xf32> to vector<8x128xf32>
    %24 = arith.subf %18, %23 : vector<8x128xf32>
    %25 = arith.truncf %24 : vector<8x128xf32> to vector<8x128xbf16>
    %c0_13 = arith.constant 0 : index
    %c0_14 = arith.constant 0 : index
    %26 = vector.load %arg6[%c0_13, %c0_14] : memref<8x128xbf16, #tpu.memory_space<vmem>>, vector<8x128xbf16>
    tpu.vector_store %arg6[%c0_13, %c0_14], %25 {strides = array<i32>} : memref<8x128xbf16, #tpu.memory_space<vmem>>, vector<8x128xbf16>,
    return
  }
  func.func @transform_0(%arg0: i32) -> (i32, i32) {
    %c0_i32 = arith.constant 0 : i32
    %c0_i32_0 = arith.constant 0 : i32
    return %arg0, %c0_i32 : i32, i32
  }
  func.func @transform_1(%arg0: i32) -> (i32, i32) {
    %c0_i32 = arith.constant 0 : i32
    %c0_i32_0 = arith.constant 0 : i32
    %c0_i32_1 = arith.constant 0 : i32
    return %c0_i32, %c0_i32_0 : i32, i32
  }
  func.func @transform_2(%arg0: i32) -> (i32, i32) {
    %c0_i32 = arith.constant 0 : i32
    %c0_i32_0 = arith.constant 0 : i32
    %c0_i32_1 = arith.constant 0 : i32
    return %c0_i32, %c0_i32_0 : i32, i32
  }
  func.func @transform_3(%arg0: i32) -> (i32, i32) {
    %c0_i32 = arith.constant 0 : i32
    %c0_i32_0 = arith.constant 0 : i32
    %c0_i32_1 = arith.constant 0 : i32
    return %c0_i32, %c0_i32_0 : i32, i32
  }
  func.func @transform_4(%arg0: i32) -> (i32, i32) {
    %c0_i32 = arith.constant 0 : i32
    %c0_i32_0 = arith.constant 0 : i32
    %c0_i32_1 = arith.constant 0 : i32
    return %c0_i32, %c0_i32_0 : i32, i32
  }
  func.func @transform_5(%arg0: i32) -> (i32, i32) {
    %c0_i32 = arith.constant 0 : i32
    %c0_i32_0 = arith.constant 0 : i32
    return %arg0, %c0_i32 : i32, i32
  }
}

</mosaic_0001>

<bundles_post_ra>
// kernel: mnist_forward.1
= control target key start
LH: loop header
LB: loop body
LE: loop exit
PB: predicated region body
PF: predicated region fallthrough
CT: control target
= control target key end

     0   :  { %v953_v44 = vmov 0.0   ;;  %vm954_vm0 = vmmov 0   ;;  %vm434_vm1 = vcmask 130048   ;;  %s1199_s1 = inlined_call_operand.vmem [shape: bf16[784,128], index: 1, kind: input, shape index: {}]   ;;  %s1200_s0 = inlined_call_operand.vmem [shape: f32[8,784], index: 0, kind: input, shape index: {}]   ;;  %s1201_s3 = inlined_call_operand.vmem [shape: bf16[128,128], index: 3, kind: input, shape index: {}]   ;;  %s1202_s2 = inlined_call_operand.vmem [shape: f32[1,128], index: 2, kind: input, shape index: {}]   ;;  %s1203_s4 = inlined_call_operand.vmem [shape: f32[1,128], index: 4, kind: input, shape index: {}]   ;;  %s1204_s5 = inlined_call_operand.vmem [shape: bf16[8,128], index: 5, kind: output, shape index: {}]  }
   0x1   :  { %v892_v0 = vld [vmem:[%s1199_s1 + $0x78] sm:$0xff]   ;;  %v896_v4 = vld [vmem:[%s1199_s1 + $0x70] sm:$0xff]   ;;  %v900_v8 = vld [vmem:[%s1199_s1 + $0x68] sm:$0xff]  }
   0x2   :  { %v893_v1 = vld [vmem:[%s1199_s1 + $0x38] sm:$0xff]   ;;  %787 = vmatprep.subr.bf16.mxu0 %v892_v0  ;;  %v897_v5 = vld [vmem:[%s1199_s1 + $0x30] sm:$0xff]   ;;  %v901_v9 = vld [vmem:[%s1199_s1 + $0x28] sm:$0xff]  }
   0x3   :  { %v894_v2 = vld [vmem:[%s1199_s1 + $0xf8] sm:$0xff]   ;;  %788 = vmatpush3.bf16.msra.mxu0 %v893_v1  ;;  %v898_v6 = vld [vmem:[%s1199_s1 + $0xf0] sm:$0xff]   ;;  %v902_v10 = vld [vmem:[%s1199_s1 + $0xe8] sm:$0xff]  }
   0x4   :  { %v895_v3 = vld [vmem:[%s1199_s1 + $0xb8] sm:$0xff]   ;;  %809 = vmatprep.subr.bf16.mxu1 %v894_v2  ;;  %789 = vmatprep.subr.bf16.mxu0 %v896_v4  ;;  %v899_v7 = vld [vmem:[%s1199_s1 + $0xb0] sm:$0xff]   ;;  %v903_v11 = vld [vmem:[%s1199_s1 + $0xa8] sm:$0xff]  }
   0x5   :  { %810 = vmatpush3.bf16.msra.mxu1 %v895_v3  ;;  %v904_v12 = vld [vmem:[%s1199_s1 + $0x60] sm:$0xff]   ;;  %v908_v16 = vld [vmem:[%s1199_s1 + $0x58] sm:$0xff]   ;;  %v912_v20 = vld [vmem:[%s1199_s1 + $0x50] sm:$0xff]  }
   0x6   :  { %811 = vmatprep.subr.bf16.mxu1 %v898_v6  ;;  %v905_v13 = vld [vmem:[%s1199_s1 + $0x20] sm:$0xff]   ;;  %v909_v17 = vld [vmem:[%s1199_s1 + $0x18] sm:$0xff]   ;;  %v913_v21 = vld [vmem:[%s1199_s1 + $0x10] sm:$0xff]  }
   0x7   :  { %790 = vmatpush3.bf16.msra.mxu0 %v897_v5  ;;  %v906_v14 = vld [vmem:[%s1199_s1 + $0xe0] sm:$0xff]   ;;  %v910_v18 = vld [vmem:[%s1199_s1 + $0xd8] sm:$0xff]   ;;  %v914_v22 = vld [vmem:[%s1199_s1 + $0xd0] sm:$0xff]  }
   0x8   :  { %791 = vmatprep.subr.bf16.mxu0 %v900_v8  ;;  %v907_v15 = vld [vmem:[%s1199_s1 + $0xa0] sm:$0xff]   ;;  %v911_v19 = vld [vmem:[%s1199_s1 + $0x98] sm:$0xff]   ;;  %v915_v23 = vld [vmem:[%s1199_s1 + $0x90] sm:$0xff]  }
   0x9   :  { %812 = vmatpush3.bf16.msra.mxu1 %v899_v7  ;;  %v916_v24 = vld [vmem:[%s1199_s1 + $0x48] sm:$0xff]   ;;  %v920_v28 = vld [vmem:[%s1199_s1 + $0x40] sm:$0xff]   ;;  %v924_v36 = vld [vmem:[%s1199_s1 + $0x178] sm:$0xff]  }
   0xa   :  { %813 = vmatprep.subr.bf16.mxu1 %v902_v10  ;;  %v917_v25 = vld [vmem:[%s1199_s1 + $0x8] sm:$0xff]   ;;  %v921_v29 = vld [vmem:[%s1199_s1] sm:$0xff]   ;;  %v24_v37 = vld [vmem:[%s1200_s0 + $0x18] sm:$0xff] }
   0xb   :  { %792 = vmatpush3.bf16.msra.mxu0 %v901_v9  ;;  %v918_v26 = vld [vmem:[%s1199_s1 + $0xc8] sm:$0xff]   ;;  %v922_v30 = vld [vmem:[%s1199_s1 + $0xc0] sm:$0xff]   ;;  %v31_v38 = vpack.c.bf16 %v24_v37, %v24_v37  ;;  %v925_v39 = vld [vmem:[%s1199_s1 + $0x138] sm:$0xff]  }
   0xc   :  { %793 = vmatprep.subr.bf16.mxu0 %v904_v12  ;;  %v919_v27 = vld [vmem:[%s1199_s1 + $0x88] sm:$0xff]   ;;  %v923_v33 = vld [vmem:[%s1199_s1 + $0x80] sm:$0xff]   ;;  %v23_v40 = vld [vmem:[%s1200_s0 + $0x10] sm:$0xff] }
   0xd   :  { %814 = vmatpush3.bf16.msra.mxu1 %v903_v11  ;;  %v22_v31 = vld [vmem:[%s1200_s0 + $0x8] sm:$0xff]  ;;  %v21_v34 = vld [vmem:[%s1200_s0] sm:$0xff]  ;;  %510 = vmatprep.mubr.bf16.mxu1 %v31_v38  ;;  %v30_v41 = vpack.c.bf16 %v23_v40, %v23_v40  ;;  %v926_v42 = vld [vmem:[%s1199_s1 + $0x170] sm:$0xff]  }
   0xe   :  { %815 = vmatprep.subr.bf16.mxu1 %v906_v14  ;;  %v29_v32 = vpack.c.bf16 %v22_v31, %v22_v31  ;;  %v28_v35 = vpack.c.bf16 %v21_v34, %v21_v34  ;;  %v927_v43 = vld [vmem:[%s1199_s1 + $0x130] sm:$0xff]   ;;  %v928_v45 = vld [vmem:[%s1199_s1 + $0x168] sm:$0xff]   ;;  %v930_v47 = vld [vmem:[%s1199_s1 + $0x160] sm:$0xff]  }
   0xf   :  { %794 = vmatpush3.bf16.msra.mxu0 %v905_v13  ;;  %v929_v46 = vld [vmem:[%s1199_s1 + $0x128] sm:$0xff]   ;;  %v931_v48 = vld [vmem:[%s1199_s1 + $0x120] sm:$0xff]   ;;  %v932_v49 = vld [vmem:[%s1199_s1 + $0x158] sm:$0xff]  }
  0x10   :  { %795 = vmatprep.subr.bf16.mxu0 %v908_v16  ;;  %470 = vmatprep.mubr.bf16.mxu0 %v29_v32  ;;  %v933_v50 = vld [vmem:[%s1199_s1 + $0x118] sm:$0xff]   ;;  %v934_v51 = vld [vmem:[%s1199_s1 + $0x150] sm:$0xff]   ;;  %v940_v52 = vld [vmem:[%s1199_s1 + $0x180] sm:$0xff]  }
  0x11   :  { %816 = vmatpush3.bf16.msra.mxu1 %v907_v15  ;;  %v26_v53 = vld [vmem:[%s1200_s0 + $0x28] sm:$0xff]  ;;  %v27_v55 = vld [vmem:[%s1200_s0 + $0x30] sm:$0xff]  ;;  %v938_v60 = vld [vmem:[%s1199_s1 + $0x140] sm:$0xff]  }
  0x12   :  { %817 = vmatprep.subr.bf16.mxu1 %v910_v18  ;;  %v33_v54 = vpack.c.bf16 %v26_v53, %v26_v53  ;;  %v935_v56 = vld [vmem:[%s1199_s1 + $0x110] sm:$0xff]   ;;  %v34_v57 = vpack.c.bf16 %v27_v55, %v27_v55  ;;  %v936_v58 = vld [vmem:[%s1199_s1 + $0x148] sm:$0xff]   ;;  %v939_v61 = vld [vmem:[%s1199_s1 + $0x100] sm:$0xff]  }
  0x13   :  { %796 = vmatpush3.bf16.msra.mxu0 %v909_v17  ;;  %v937_v59 = vld [vmem:[%s1199_s1 + $0x108] sm:$0xff]   ;;  %v25_v62 = vld [vmem:[%s1200_s0 + $0x20] sm:$0xff]  ;;  %v941_v0 = vld [vmem:[%s1201_s3 + $0x38] sm:$0xff]  }
  0x14   :  { %797 = vmatprep.subr.bf16.mxu0 %v912_v20  ;;  %v32_v63 = vpack.c.bf16 %v25_v62, %v25_v62  ;;  %v942_v1 = vld [vmem:[%s1201_s3 + $0x30] sm:$0xff]   ;;  %v943_v2 = vld [vmem:[%s1201_s3 + $0x28] sm:$0xff]   ;;  %v944_v3 = vld [vmem:[%s1201_s3 + $0x20] sm:$0xff]  }
  0x15   :  { %818 = vmatpush3.bf16.msra.mxu1 %v911_v19  ;;  %v945_v4 = vld [vmem:[%s1201_s3 + $0x18] sm:$0xff]   ;;  %v946_v5 = vld [vmem:[%s1201_s3 + $0x10] sm:$0xff]   ;;  %v947_v6 = vld [vmem:[%s1201_s3 + $0x8] sm:$0xff]  }
  0x16   :  { %819 = vmatprep.subr.bf16.mxu1 %v914_v22  ;;  %v948_v7 = vld [vmem:[%s1201_s3] sm:$0xff]  }
  0x17   :  { %798 = vmatpush3.bf16.msra.mxu0 %v913_v21  ;;  %v727_v21 = vld [vmem:[%s1202_s2] ss:$0 sm:$0xff] }
  0x18   :  { %799 = vmatprep.subr.bf16.mxu0 %v916_v24  ;;  %v778_v34 = vld [vmem:[%s1203_s4] ss:$0 sm:$0xff] }
  0x19   :  { %820 = vmatpush3.bf16.msra.mxu1 %v915_v23 }
  0x1a   :  { %821 = vmatprep.subr.bf16.mxu1 %v918_v26 }
  0x1b   :  { %800 = vmatpush3.bf16.msra.mxu0 %v917_v25 }
  0x1c   :  { %801 = vmatprep.subr.bf16.mxu0 %v920_v28 }
  0x1d   :  { %822 = vmatpush3.bf16.msra.mxu1 %v919_v27 }
  0x1e   :  { %823 = vmatprep.subr.bf16.mxu1 %v922_v30 }
  0x1f   :  { %802 = vmatpush3.bf16.msra.mxu0 %v921_v29 }
  0x20   :  { %831 = vmatprep.subr.bf16.mxu0 %v924_v36 }
  0x21   :  { %824 = vmatpush3.bf16.msra.mxu1 %v923_v33 }
  0x22   :  { %471 = vmatmul.mubr.bf16.vlgmr.msra.gmra.mxu0 %v28_v35  ;;  %864 = vmatprep.subr.bf16.mxu1 %v953_v44 }
  0x23   :  { %832 = vmatpush3.bf16.msra.mxu0 %v925_v39  ;;  %550 = vmatprep.mubr.bf16.mxu0 %v33_v54 }
  0x24   :  { %511 = vmatmul.mubr.bf16.vlgmr.msra.gmra.mxu1 %v30_v41  ;;  %833 = vmatprep.subr.bf16.mxu0 %v926_v42 }
  0x25   :  { %866 = vmatprep.mubr.msk.bf16.mxu1 %vm954_vm0, %v953_v44  ;;  %865 = vmatpush3.bf16.msra.mxu1 %v940_v52 }
  0x26   :  { %870 = vmatprep.subr.bf16.mxu1 %v953_v44 }
  0x27   :  { %834 = vmatpush3.bf16.msra.mxu0 %v927_v43 }
  0x28   :  { %835 = vmatprep.subr.bf16.mxu0 %v928_v45 }
  0x2b   :  { %836 = vmatpush3.bf16.msra.mxu0 %v929_v46 }
  0x2c   :  { %837 = vmatprep.subr.bf16.mxu0 %v930_v47  ;;  %867 = vmatmul.mubr.msk.bf16.vlgmr.msra.gmra.mxu1 %vm434_vm1, %v34_v57 }
  0x2d   :  { %886 = vmatprep.mubr.msk.bf16.mxu1 %vm954_vm0, %v953_v44  ;;  %871 = vmatpush3.bf16.msra.mxu1 %v941_v0 }
  0x2e   :  { %872 = vmatprep.subr.bf16.mxu1 %v953_v44 }
  0x2f   :  { %838 = vmatpush3.bf16.msra.mxu0 %v931_v48 }
  0x30   :  { %839 = vmatprep.subr.bf16.mxu0 %v932_v49 }
  0x31   :  { %873 = vmatpush3.bf16.msra.mxu1 %v942_v1 }
  0x32   :  { %874 = vmatprep.subr.bf16.mxu1 %v953_v44 }
  0x33   :  { %840 = vmatpush3.bf16.msra.mxu0 %v933_v50 }
  0x34   :  { %841 = vmatprep.subr.bf16.mxu0 %v934_v51 }
  0x35   :  { %875 = vmatpush3.bf16.msra.mxu1 %v943_v2 }
  0x36   :  { %876 = vmatprep.subr.bf16.mxu1 %v953_v44 }
  0x37   :  { %842 = vmatpush3.bf16.msra.mxu0 %v935_v56 }
  0x38   :  { %843 = vmatprep.subr.bf16.mxu0 %v936_v58 }
  0x39   :  { %877 = vmatpush3.bf16.msra.mxu1 %v944_v3 }
  0x3a   :  { %878 = vmatprep.subr.bf16.mxu1 %v953_v44 }
  0x3b   :  { %844 = vmatpush3.bf16.msra.mxu0 %v937_v59 }
  0x3c   :  { %845 = vmatprep.subr.bf16.mxu0 %v938_v60 }
  0x3d   :  { %879 = vmatpush3.bf16.msra.mxu1 %v945_v4 }
  0x3e   :  { %880 = vmatprep.subr.bf16.mxu1 %v953_v44 }
  0x3f   :  { %846 = vmatpush3.bf16.msra.mxu0 %v939_v61 }
  0x41   :  { %881 = vmatpush3.bf16.msra.mxu1 %v946_v5 }
  0x42   :  { %551 = vmatmul.mubr.bf16.vlgmr.msra.gmra.mxu0 %v32_v63  ;;  %882 = vmatprep.subr.bf16.mxu1 %v953_v44 }
  0x45   :  { %883 = vmatpush3.bf16.msra.mxu1 %v947_v6 }
  0x46   :  { %884 = vmatprep.subr.bf16.mxu1 %v953_v44 }
  0x49   :  { %885 = vmatpush3.bf16.msra.mxu1 %v948_v7 }
  0xe2   :  { %v803_v8 = vpop.f32.mrf.mxu0 }
  0xe4   :  { %v804_v9 = vpop.f32.mrf.mxu0  ;;  %v825_v10 = vpop.f32.mrf.mxu1 }
  0xe5   :  { %v805_v20 = vadd.f32 %v804_v9, %v803_v8 }
  0xe6   :  { %v806_v11 = vpop.f32.mrf.mxu0  ;;  %v826_v12 = vpop.f32.mrf.mxu1 }
  0xe7   :  { %v473_v22 = vadd.f32 %v805_v20, %v727_v21  ;;  %v827_v23 = vadd.f32 %v826_v12, %v825_v10 }
  0xe8   :  { %v807_v13 = vpop.f32.mrf.mxu0  ;;  %v828_v14 = vpop.f32.mrf.mxu1 }
  0xe9   :  { %v513_v26 = vadd.f32 %v827_v23, %v473_v22 }
  0xea   :  { %v829_v15 = vpop.f32.mrf.mxu1 }
  0xec   :  { %v592_v16 = vpop.f32.mrf.mxu1 }
  0xee   :  { %v868_v17 = vpop.f32.mrf.mxu1 }
  0xf0   :  { %v595_v18 = vpop.f32.mrf.mxu1 }
  0xf2   :  { %v869_v19 = vpop.f32.mrf.mxu1 }
 0x102   :  { %v847_v24 = vpop.f32.mrf.mxu0 }
 0x104   :  { %v848_v25 = vpop.f32.mrf.mxu0 }
 0x105   :  { %v849_v27 = vadd.f32 %v848_v25, %v847_v24 }
 0x106   :  { %v850_v28 = vpop.f32.mrf.mxu0 }
 0x107   :  { %v553_v29 = vadd.f32 %v849_v27, %v513_v26 }
 0x108   :  { %v851_v30 = vpop.f32.mrf.mxu0 }
 0x109   :  { %v593_v31 = vadd.f32 %v592_v16, %v553_v29 }
 0x10b   :  { %v598_v32 = vmax.f32 %v593_v31, 0.0 }
 0x10d   :  { %v599_v33 = vpack.c.bf16 %v598_v32, %v598_v32 }
 0x10f   :  { %887 = vmatmul.mubr.bf16.vlgmr.msra.gmra.mxu1 %v599_v33 }
 0x1cf   :  { %v705_v35 = vpop.f32.mrf.mxu1 }
 0x1d0   :  { %v706_v36 = vadd.f32 %v778_v34, %v705_v35 }
 0x1d1   :  { %v888_v37 = vpop.f32.mrf.mxu1 }
 0x1d2   :  { %711 = vmax.xlane.f32.xlu0 %v706_v36 }
 0x1d3   :  { %v708_v38 = vpop.f32.mrf.mxu1 }
 0x1d5   :  { %v889_v39 = vpop.f32.mrf.mxu1 }
 0x25b   :  { %v712_v40 = vpop.xlane.xlu0 %711 }
 0x25c   :  { %v713_v41 = vsub.f32 %v706_v36, %v712_v40 }
 0x25e   :  { %v714_v42 = vmul.f32 1.442695, %v713_v41 }
 0x260   :  { %949 = vpow2.f32 %v714_v42 }
 0x26d   :  { %v950_v43 = vpop.eup %949 }
 0x26e   :  { %716 = vadd.xlane.f32.xlu0 %v950_v43 }
 0x2f7   :  { %v717_v44 = vpop.xlane.xlu0 %716 }
 0x2f8   :  { %951 = vlog2.f32 %v717_v44 }
 0x305   :  { %v952_v45 = vpop.eup %951 }
 0x306   :  { %v719_v46 = vmul.f32 0.6931472, %v952_v45 }
 0x308   :  { %v720_v47 = vsub.f32 %v713_v41, %v719_v46 }
 0x30a   :  { %v721_v48 = vpack.c.bf16 %v720_v47, %v720_v47 }
 0x30c   :  { %722 = vst [vmem:[%s1204_s5] sm:$0xf] %v721_v48 }

</bundles_post_ra>
